<compile_context>
chip_gen: v6e
topology: v6e:2x2x1
jax: 0.10.0
libtpu: 0.0.40
codegen_flags: <defaults>
</compile_context>

<pallas_src>
import math
import functools

import jax
import jax.numpy as jnp
from jax.experimental import pallas as pl
from jax.experimental.pallas import tpu as pltpu


def _round_up(x, m):
    return ((x + m - 1) // m) * m


# ----------------------------------------------------------------------------
# Tiled linear kernel:  o = x @ w + b
# ----------------------------------------------------------------------------
def _linear_kernel(x_ref, w_ref, b_ref, o_ref, acc_ref):
    k = pl.program_id(2)

    @pl.when(k == 0)
    def _():
        acc_ref[...] = jnp.zeros_like(acc_ref)

    acc_ref[...] += jnp.dot(x_ref[...], w_ref[...],
                            preferred_element_type=jnp.float32)

    @pl.when(k == pl.num_programs(2) - 1)
    def _():
        o_ref[...] = (acc_ref[...] + b_ref[...]).astype(o_ref.dtype)


def pallas_linear(x, w, b, *, max_tm=256, max_tn=256, max_tk=512,
                  out_dtype=jnp.float32):
    """x: (M, K), w: (K, N), b: (1, N) -> (M, N).  bf16 MXU, f32 accumulation."""
    M, K = x.shape
    N = w.shape[1]
    tm, tn, tk = min(M, max_tm), min(N, max_tn), min(K, max_tk)
    Mp, Kp, Np = _round_up(M, tm), _round_up(K, tk), _round_up(N, tn)

    # Zero-pad so the K reduction never touches undefined padding; M/N padding
    # produces extra rows/cols that are sliced off below.
    if (Mp, Kp) != (M, K):
        x = jnp.pad(x, ((0, Mp - M), (0, Kp - K)))
    if (Kp, Np) != (K, N):
        w = jnp.pad(w, ((0, Kp - K), (0, Np - N)))
    if Np != N:
        b = jnp.pad(b, ((0, 0), (0, Np - N)))

    out = pl.pallas_call(
        _linear_kernel,
        out_shape=jax.ShapeDtypeStruct((Mp, Np), out_dtype),
        grid_spec=pltpu.PrefetchScalarGridSpec(
            num_scalar_prefetch=0,
            grid=(Mp // tm, Np // tn, Kp // tk),
            in_specs=[
                pl.BlockSpec((tm, tk), lambda i, j, k: (i, k)),
                pl.BlockSpec((tk, tn), lambda i, j, k: (k, j)),
                pl.BlockSpec((1, tn), lambda i, j, k: (0, j)),
            ],
            out_specs=pl.BlockSpec((tm, tn), lambda i, j, k: (i, j)),
            scratch_shapes=[pltpu.VMEM((tm, tn), jnp.float32)],
        ),
        compiler_params=pltpu.CompilerParams(
            dimension_semantics=("parallel", "parallel", "arbitrary")),
    )(x.astype(jnp.bfloat16), w.astype(jnp.bfloat16), b.astype(jnp.float32))

    if (Mp, Np) != (M, N):
        out = out[:M, :N]
    return out


# ----------------------------------------------------------------------------
# Fused dense MoE kernel: all experts batched along the feature dimension.
#   h  = relu(x @ W1_cat + b1_cat)            W1_cat: (D, E*F)   (lane-dense)
#   y  = (h * gate_exp) @ W2_stack + b2_term  W2_stack: (E*F, D)
# ----------------------------------------------------------------------------
def _moe_fused_kernel(x_ref, w1_ref, b1_ref, w2_ref, ge_ref, b2t_ref, o_ref):
    h = jnp.dot(x_ref[...], w1_ref[...], preferred_element_type=jnp.float32)
    h = jnp.maximum(h + b1_ref[...], 0.0)
    # Fold top-k gates into the activations, then one block-stacked down-proj.
    hg = (h * ge_ref[...]).astype(jnp.bfloat16)
    y = jnp.dot(hg, w2_ref[...], preferred_element_type=jnp.float32)
    o_ref[...] = (y + b2t_ref[...]).astype(o_ref.dtype)


def pallas_moe_experts(tok, w1c, b1c, w2s, b2m, gate_mat, *, max_tt=512):
    """tok: (T, D); w1c: (D, E*F); b1c: (1, E*F); w2s: (E*F, D); b2m: (E, D);
    gate_mat: (T, E) dense top-k gates -> (T, D)."""
    T, D = tok.shape
    EF = w1c.shape[1]
    E = b2m.shape[0]
    F = EF // E

    tT = min(T, max_tt)
    Tp = _round_up(T, tT)
    if Tp != T:
        tok = jnp.pad(tok, ((0, Tp - T), (0, 0)))
        gate_mat = jnp.pad(gate_mat, ((0, Tp - T), (0, 0)))

    # Per-token glue (XLA fuses these into the surrounding elementwise graph):
    gate_exp = jnp.repeat(gate_mat, F, axis=1)       # (Tp, E*F) lane-dense gates
    b2_term = gate_mat @ b2m                         # gate-weighted expert biases

    out = pl.pallas_call(
        _moe_fused_kernel,
        out_shape=jax.ShapeDtypeStruct((Tp, D), jnp.float32),
        grid_spec=pltpu.PrefetchScalarGridSpec(
            num_scalar_prefetch=0,
            grid=(Tp // tT,),
            in_specs=[
                pl.BlockSpec((tT, D), lambda t: (t, 0)),    # tokens
                pl.BlockSpec((D, EF), lambda t: (0, 0)),    # W1 concat (resident)
                pl.BlockSpec((1, EF), lambda t: (0, 0)),    # b1 concat
                pl.BlockSpec((EF, D), lambda t: (0, 0)),    # W2 stack (resident)
                pl.BlockSpec((tT, EF), lambda t: (t, 0)),   # expanded gates
                pl.BlockSpec((tT, D), lambda t: (t, 0)),    # gate-weighted b2
            ],
            out_specs=pl.BlockSpec((tT, D), lambda t: (t, 0)),
        ),
        compiler_params=pltpu.CompilerParams(
            dimension_semantics=("parallel",)),
    )(tok.astype(jnp.bfloat16), w1c.astype(jnp.bfloat16),
      b1c.astype(jnp.float32), w2s.astype(jnp.bfloat16),
      gate_exp.astype(jnp.float32), b2_term.astype(jnp.float32))

    return out[:T] if Tp != T else out


# ----------------------------------------------------------------------------
# Parameter init (mirrors module __init__; weights pre-laid-out for the kernels)
# ----------------------------------------------------------------------------
def xavier_uniform(key, shape, gain=1.0):
    fan_out, fan_in = shape  # torch Linear weight is (out, in)
    bound = gain * math.sqrt(6.0 / (fan_in + fan_out))
    return jax.random.uniform(key, shape, jnp.float32, -bound, bound)


def init_params(key, hidden, num_heads, num_experts, ffn_dim):
    head_dim = hidden // num_heads
    ks = jax.random.split(key, 8)
    p = {}
    # multi_head_layer: Linear(H, H), xavier_uniform(gain=1/sqrt(2)); store (K, N)
    mh_w = xavier_uniform(ks[0], (hidden, hidden), gain=1.0 / math.sqrt(2.0))
    bnd = 1.0 / math.sqrt(hidden)
    p["mh_w"] = jnp.transpose(mh_w)
    p["mh_b"] = jax.random.uniform(ks[1], (1, hidden), jnp.float32, -bnd, bnd)
    # merge_layer: Linear(H, H), xavier_uniform(gain=1), bias=0; store (K, N)
    mg_w = xavier_uniform(ks[2], (hidden, hidden), gain=1.0)
    p["mg_w"] = jnp.transpose(mg_w)
    p["mg_b"] = jnp.zeros((1, hidden), jnp.float32)
    # nested MoE router (hidden_size = head_dim); store (K, N)
    rt_w = xavier_uniform(ks[3], (num_experts, head_dim))
    p["rt_w"] = jnp.transpose(rt_w)
    p["rt_b"] = jnp.zeros((num_experts,), jnp.float32)
    # expert MLPs, pre-concatenated for the fused kernel
    w1 = 0.1 * jax.random.normal(ks[4], (num_experts, head_dim, ffn_dim), jnp.float32)
    b1 = jnp.zeros((num_experts, 1, ffn_dim), jnp.float32)
    w2 = 0.1 * jax.random.normal(ks[5], (num_experts, ffn_dim, head_dim), jnp.float32)
    b2 = jnp.zeros((num_experts, 1, head_dim), jnp.float32)
    p["e_w1c"] = jnp.transpose(w1, (1, 0, 2)).reshape(head_dim, num_experts * ffn_dim)
    p["e_b1c"] = b1.reshape(1, num_experts * ffn_dim)
    p["e_w2s"] = w2.reshape(num_experts * ffn_dim, head_dim)
    p["e_b2m"] = b2.reshape(num_experts, head_dim)
    return p


# ----------------------------------------------------------------------------
# MH-MoE forward (Pallas hot paths + JAX glue)
# ----------------------------------------------------------------------------
@functools.partial(jax.jit, static_argnames=("num_heads", "num_experts", "top_k"))
def mh_moe_forward(params, x, *, num_heads, num_experts, top_k):
    B, S, H = x.shape
    head_dim = H // num_heads
    T = B * S * num_heads

    # 1) multi_head_layer: Linear(H, H)
    x2 = pallas_linear(x.reshape(B * S, H), params["mh_w"], params["mh_b"])

    # 2) reshape to (B, sub_seq, head_dim) -> flat head-tokens (layout-identical)
    tok = x2.reshape(T, head_dim)

    # 3) nested VectorizedMoE — router in plain JAX (tiny matmul, XLA fuses it)
    logits = tok @ params["rt_w"] + params["rt_b"]          # (T, E)
    probs = jax.nn.softmax(logits, axis=-1)
    topv, topi = jax.lax.top_k(probs, top_k)
    topv = topv / jnp.sum(topv, axis=-1, keepdims=True)     # renormalized top-k gates
    onehots = jax.nn.one_hot(topi, num_experts, dtype=jnp.float32)  # (T, k, E)
    sel_mask = jnp.sum(onehots, axis=1)                     # (T, E)
    gate_mat = jnp.sum(onehots * topv[..., None], axis=1)   # (T, E), no scatter

    moe_out = pallas_moe_experts(
        tok, params["e_w1c"], params["e_b1c"], params["e_w2s"], params["e_b2m"],
        gate_mat)

    # TODO(synk): VectorizedMoE reference not provided — standard aux loss E*sum(f*P).
    f = jnp.mean(sel_mask, axis=0) / top_k
    P = jnp.mean(probs, axis=0)
    load_balancing_loss = num_experts * jnp.sum(f * P)

    # 4) (B, S, heads, head_dim) -> (B, S, H) is layout-identical to (B*S, H)
    # 5) merge_layer: Linear(H, H)
    y = pallas_linear(moe_out.reshape(B * S, H), params["mg_w"], params["mg_b"])
    return y.reshape(B, S, H), load_balancing_loss


# ----------------------------------------------------------------------------
if __name__ == "__main__":
    # config: batch=2, seq_len=8, hidden=32, num_MH_MOE_heads=4 -> head_dim=8
    batch, seq_len, hidden = 2, 8, 32
    num_heads = 4
    num_experts, top_k, ffn_dim = 4, 2, 32

    key = jax.random.PRNGKey(0)
    k_param, k_x = jax.random.split(key)
    params = init_params(k_param, hidden, num_heads, num_experts, ffn_dim)
    x = jax.random.normal(k_x, (batch, seq_len, hidden), jnp.float32)

    out, lb_loss = mh_moe_forward(
        params, x, num_heads=num_heads, num_experts=num_experts, top_k=top_k)
    jax.block_until_ready((out, lb_loss))

    assert out.shape == (batch, seq_len, hidden)
    assert lb_loss.shape == ()
    assert jnp.all(jnp.isfinite(out)) and jnp.isfinite(lb_loss)
    print("KERNEL_OK")
</pallas_src>

<mosaic_0001>
module attributes {stable_mosaic.version = 11 : i64} {
  func.func @_linear_kernel(%arg0: i32, %arg1: i32, %arg2: i32, %arg3: memref<16x32xbf16, #tpu.memory_space<vmem>>, %arg4: memref<32x32xbf16, #tpu.memory_space<vmem>>, %arg5: memref<1x32xf32, #tpu.memory_space<vmem>>, %arg6: memref<16x32xf32, #tpu.memory_space<vmem>>, %arg7: memref<16x32xf32, #tpu.memory_space<vmem>>) attributes {dimension_semantics = [#tpu.dimension_semantics<parallel>, #tpu.dimension_semantics<parallel>, #tpu.dimension_semantics<arbitrary>], iteration_bounds = array<i64: 1, 1, 1>, scalar_prefetch = 0 : i64, scratch_operands = 1 : i64, tpu.core_type = #tpu.core_type<tc>, window_params = [{transform_indices = @transform_0, window_bounds = array<i64: 16, 32>}, {transform_indices = @transform_1, window_bounds = array<i64: 32, 32>}, {transform_indices = @transform_2, window_bounds = array<i64: 1, 32>}, {transform_indices = @transform_3, window_bounds = array<i64: 16, 32>}]} {
    %c0_i32 = arith.constant 0 : i32
    %0 = arith.cmpi eq, %arg2, %c0_i32 : i32
    %1 = arith.extui %0 : i1 to i32
    %c0_i32_0 = arith.constant 0 : i32
    %2 = arith.cmpi ne, %1, %c0_i32_0 : i32
    scf.if %2 {
      %cst_10 = arith.constant 0.000000e+00 : f32
      %12 = vector.broadcast %cst_10 : f32 to vector<16x32xf32>
      %c0_11 = arith.constant 0 : index
      %c0_12 = arith.constant 0 : index
      %13 = vector.load %arg7[%c0_11, %c0_12] : memref<16x32xf32, #tpu.memory_space<vmem>>, vector<16x32xf32>
      tpu.vector_store %arg7[%c0_11, %c0_12], %12 {strides = array<i32>} : memref<16x32xf32, #tpu.memory_space<vmem>>, vector<16x32xf32>,
    } else {
    }
    %c0 = arith.constant 0 : index
    %c0_1 = arith.constant 0 : index
    %3 = vector.load %arg7[%c0, %c0_1] : memref<16x32xf32, #tpu.memory_space<vmem>>, vector<16x32xf32>
    %c0_2 = arith.constant 0 : index
    %c0_3 = arith.constant 0 : index
    %4 = vector.load %arg3[%c0_2, %c0_3] : memref<16x32xbf16, #tpu.memory_space<vmem>>, vector<16x32xbf16>
    %c0_4 = arith.constant 0 : index
    %c0_5 = arith.constant 0 : index
    %5 = vector.load %arg4[%c0_4, %c0_5] : memref<32x32xbf16, #tpu.memory_space<vmem>>, vector<32x32xbf16>
    %cst = arith.constant dense<0.000000e+00> : vector<16x32xf32>
    %6 = tpu.matmul %4, %5, %cst {dimension_numbers = #tpu.dot_dimension_numbers<[1], [0], [0], [1], [0, 0, 1, 1], [], []>} : vector<16x32xbf16>, vector<32x32xbf16>, vector<16x32xf32> -> vector<16x32xf32>
    %7 = arith.addf %3, %6 : vector<16x32xf32>
    %c0_6 = arith.constant 0 : index
    %c0_7 = arith.constant 0 : index
    %8 = vector.load %arg7[%c0_6, %c0_7] : memref<16x32xf32, #tpu.memory_space<vmem>>, vector<16x32xf32>
    tpu.vector_store %arg7[%c0_6, %c0_7], %7 {strides = array<i32>} : memref<16x32xf32, #tpu.memory_space<vmem>>, vector<16x32xf32>,
    %c0_i32_8 = arith.constant 0 : i32
    %9 = arith.cmpi eq, %arg2, %c0_i32_8 : i32
    %10 = arith.extui %9 : i1 to i32
    %c0_i32_9 = arith.constant 0 : i32
    %11 = arith.cmpi ne, %10, %c0_i32_9 : i32
    scf.if %11 {
      %c0_10 = arith.constant 0 : index
      %c0_11 = arith.constant 0 : index
      %12 = vector.load %arg7[%c0_10, %c0_11] : memref<16x32xf32, #tpu.memory_space<vmem>>, vector<16x32xf32>
      %c0_12 = arith.constant 0 : index
      %c0_13 = arith.constant 0 : index
      %13 = vector.load %arg5[%c0_12, %c0_13] : memref<1x32xf32, #tpu.memory_space<vmem>>, vector<1x32xf32>
      %14 = vector.broadcast %13 : vector<1x32xf32> to vector<16x32xf32>
      %15 = arith.addf %12, %14 : vector<16x32xf32>
      %c0_14 = arith.constant 0 : index
      %c0_15 = arith.constant 0 : index
      %16 = vector.load %arg6[%c0_14, %c0_15] : memref<16x32xf32, #tpu.memory_space<vmem>>, vector<16x32xf32>
      tpu.vector_store %arg6[%c0_14, %c0_15], %15 {strides = array<i32>} : memref<16x32xf32, #tpu.memory_space<vmem>>, vector<16x32xf32>,
    } else {
    }
    return
  }
  func.func @transform_0(%arg0: i32, %arg1: i32, %arg2: i32) -> (i32, i32) {
    %c0_i32 = arith.constant 0 : i32
    return %arg0, %arg2 : i32, i32
  }
  func.func @transform_1(%arg0: i32, %arg1: i32, %arg2: i32) -> (i32, i32) {
    %c0_i32 = arith.constant 0 : i32
    return %arg2, %arg1 : i32, i32
  }
  func.func @transform_2(%arg0: i32, %arg1: i32, %arg2: i32) -> (i32, i32) {
    %c0_i32 = arith.constant 0 : i32
    %c0_i32_0 = arith.constant 0 : i32
    return %c0_i32, %arg1 : i32, i32
  }
  func.func @transform_3(%arg0: i32, %arg1: i32, %arg2: i32) -> (i32, i32) {
    %c0_i32 = arith.constant 0 : i32
    return %arg0, %arg1 : i32, i32
  }
}

module attributes {stable_mosaic.version = 11 : i64} {
  func.func @_linear_kernel(%arg0: i32, %arg1: i32, %arg2: i32, %arg3: memref<16x32xbf16, #tpu.memory_space<vmem>>, %arg4: memref<32x32xbf16, #tpu.memory_space<vmem>>, %arg5: memref<1x32xf32, #tpu.memory_space<vmem>>, %arg6: memref<16x32xf32, #tpu.memory_space<vmem>>, %arg7: memref<16x32xf32, #tpu.memory_space<vmem>>) attributes {dimension_semantics = [#tpu.dimension_semantics<parallel>, #tpu.dimension_semantics<parallel>, #tpu.dimension_semantics<arbitrary>], iteration_bounds = array<i64: 1, 1, 1>, scalar_prefetch = 0 : i64, scratch_operands = 1 : i64, tpu.core_type = #tpu.core_type<tc>, window_params = [{transform_indices = @transform_0, window_bounds = array<i64: 16, 32>}, {transform_indices = @transform_1, window_bounds = array<i64: 32, 32>}, {transform_indices = @transform_2, window_bounds = array<i64: 1, 32>}, {transform_indices = @transform_3, window_bounds = array<i64: 16, 32>}]} {
    %c0_i32 = arith.constant 0 : i32
    %0 = arith.cmpi eq, %arg2, %c0_i32 : i32
    %1 = arith.extui %0 : i1 to i32
    %c0_i32_0 = arith.constant 0 : i32
    %2 = arith.cmpi ne, %1, %c0_i32_0 : i32
    scf.if %2 {
      %cst_10 = arith.constant 0.000000e+00 : f32
      %12 = vector.broadcast %cst_10 : f32 to vector<16x32xf32>
      %c0_11 = arith.constant 0 : index
      %c0_12 = arith.constant 0 : index
      %13 = vector.load %arg7[%c0_11, %c0_12] : memref<16x32xf32, #tpu.memory_space<vmem>>, vector<16x32xf32>
      tpu.vector_store %arg7[%c0_11, %c0_12], %12 {strides = array<i32>} : memref<16x32xf32, #tpu.memory_space<vmem>>, vector<16x32xf32>,
    } else {
    }
    %c0 = arith.constant 0 : index
    %c0_1 = arith.constant 0 : index
    %3 = vector.load %arg7[%c0, %c0_1] : memref<16x32xf32, #tpu.memory_space<vmem>>, vector<16x32xf32>
    %c0_2 = arith.constant 0 : index
    %c0_3 = arith.constant 0 : index
    %4 = vector.load %arg3[%c0_2, %c0_3] : memref<16x32xbf16, #tpu.memory_space<vmem>>, vector<16x32xbf16>
    %c0_4 = arith.constant 0 : index
    %c0_5 = arith.constant 0 : index
    %5 = vector.load %arg4[%c0_4, %c0_5] : memref<32x32xbf16, #tpu.memory_space<vmem>>, vector<32x32xbf16>
    %cst = arith.constant dense<0.000000e+00> : vector<16x32xf32>
    %6 = tpu.matmul %4, %5, %cst {dimension_numbers = #tpu.dot_dimension_numbers<[1], [0], [0], [1], [0, 0, 1, 1], [], []>} : vector<16x32xbf16>, vector<32x32xbf16>, vector<16x32xf32> -> vector<16x32xf32>
    %7 = arith.addf %3, %6 : vector<16x32xf32>
    %c0_6 = arith.constant 0 : index
    %c0_7 = arith.constant 0 : index
    %8 = vector.load %arg7[%c0_6, %c0_7] : memref<16x32xf32, #tpu.memory_space<vmem>>, vector<16x32xf32>
    tpu.vector_store %arg7[%c0_6, %c0_7], %7 {strides = array<i32>} : memref<16x32xf32, #tpu.memory_space<vmem>>, vector<16x32xf32>,
    %c0_i32_8 = arith.constant 0 : i32
    %9 = arith.cmpi eq, %arg2, %c0_i32_8 : i32
    %10 = arith.extui %9 : i1 to i32
    %c0_i32_9 = arith.constant 0 : i32
    %11 = arith.cmpi ne, %10, %c0_i32_9 : i32
    scf.if %11 {
      %c0_10 = arith.constant 0 : index
      %c0_11 = arith.constant 0 : index
      %12 = vector.load %arg7[%c0_10, %c0_11] : memref<16x32xf32, #tpu.memory_space<vmem>>, vector<16x32xf32>
      %c0_12 = arith.constant 0 : index
      %c0_13 = arith.constant 0 : index
      %13 = vector.load %arg5[%c0_12, %c0_13] : memref<1x32xf32, #tpu.memory_space<vmem>>, vector<1x32xf32>
      %14 = vector.broadcast %13 : vector<1x32xf32> to vector<16x32xf32>
      %15 = arith.addf %12, %14 : vector<16x32xf32>
      %c0_14 = arith.constant 0 : index
      %c0_15 = arith.constant 0 : index
      %16 = vector.load %arg6[%c0_14, %c0_15] : memref<16x32xf32, #tpu.memory_space<vmem>>, vector<16x32xf32>
      tpu.vector_store %arg6[%c0_14, %c0_15], %15 {strides = array<i32>} : memref<16x32xf32, #tpu.memory_space<vmem>>, vector<16x32xf32>,
    } else {
    }
    return
  }
  func.func @transform_0(%arg0: i32, %arg1: i32, %arg2: i32) -> (i32, i32) {
    %c0_i32 = arith.constant 0 : i32
    return %arg0, %arg2 : i32, i32
  }
  func.func @transform_1(%arg0: i32, %arg1: i32, %arg2: i32) -> (i32, i32) {
    %c0_i32 = arith.constant 0 : i32
    return %arg2, %arg1 : i32, i32
  }
  func.func @transform_2(%arg0: i32, %arg1: i32, %arg2: i32) -> (i32, i32) {
    %c0_i32 = arith.constant 0 : i32
    %c0_i32_0 = arith.constant 0 : i32
    return %c0_i32, %arg1 : i32, i32
  }
  func.func @transform_3(%arg0: i32, %arg1: i32, %arg2: i32) -> (i32, i32) {
    %c0_i32 = arith.constant 0 : i32
    return %arg0, %arg1 : i32, i32
  }
}

module attributes {stable_mosaic.version = 11 : i64} {
  func.func @_moe_fused_kernel(%arg0: i32, %arg1: memref<64x8xbf16, #tpu.memory_space<vmem>>, %arg2: memref<8x128xbf16, #tpu.memory_space<vmem>>, %arg3: memref<1x128xf32, #tpu.memory_space<vmem>>, %arg4: memref<128x8xbf16, #tpu.memory_space<vmem>>, %arg5: memref<64x128xf32, #tpu.memory_space<vmem>>, %arg6: memref<64x8xf32, #tpu.memory_space<vmem>>, %arg7: memref<64x8xf32, #tpu.memory_space<vmem>>) attributes {dimension_semantics = [#tpu.dimension_semantics<parallel>], iteration_bounds = array<i64: 1>, scalar_prefetch = 0 : i64, scratch_operands = 0 : i64, tpu.core_type = #tpu.core_type<tc>, window_params = [{transform_indices = @transform_0, window_bounds = array<i64: 64, 8>}, {pipeline_mode = #tpu.pipeline_mode<synchronous>, transform_indices = @transform_1, window_bounds = array<i64: 8, 128>}, {pipeline_mode = #tpu.pipeline_mode<synchronous>, transform_indices = @transform_2, window_bounds = array<i64: 1, 128>}, {pipeline_mode = #tpu.pipeline_mode<synchronous>, transform_indices = @transform_3, window_bounds = array<i64: 128, 8>}, {transform_indices = @transform_4, window_bounds = array<i64: 64, 128>}, {transform_indices = @transform_5, window_bounds = array<i64: 64, 8>}, {transform_indices = @transform_6, window_bounds = array<i64: 64, 8>}]} {
    %c0 = arith.constant 0 : index
    %c0_0 = arith.constant 0 : index
    %0 = vector.load %arg1[%c0, %c0_0] : memref<64x8xbf16, #tpu.memory_space<vmem>>, vector<64x8xbf16>
    %c0_1 = arith.constant 0 : index
    %c0_2 = arith.constant 0 : index
    %1 = vector.load %arg2[%c0_1, %c0_2] : memref<8x128xbf16, #tpu.memory_space<vmem>>, vector<8x128xbf16>
    %cst = arith.constant dense<0.000000e+00> : vector<64x128xf32>
    %2 = tpu.matmul %0, %1, %cst {dimension_numbers = #tpu.dot_dimension_numbers<[1], [0], [0], [1], [0, 0, 1, 1], [], []>} : vector<64x8xbf16>, vector<8x128xbf16>, vector<64x128xf32> -> vector<64x128xf32>
    %c0_3 = arith.constant 0 : index
    %c0_4 = arith.constant 0 : index
    %3 = vector.load %arg3[%c0_3, %c0_4] : memref<1x128xf32, #tpu.memory_space<vmem>>, vector<1x128xf32>
    %4 = vector.broadcast %3 : vector<1x128xf32> to vector<64x128xf32>
    %5 = arith.addf %2, %4 : vector<64x128xf32>
    %cst_5 = arith.constant 0.000000e+00 : f32
    %6 = vector.broadcast %cst_5 : f32 to vector<64x128xf32>
    %7 = arith.maximumf %5, %6 : vector<64x128xf32>
    %c0_6 = arith.constant 0 : index
    %c0_7 = arith.constant 0 : index
    %8 = vector.load %arg5[%c0_6, %c0_7] : memref<64x128xf32, #tpu.memory_space<vmem>>, vector<64x128xf32>
    %9 = arith.mulf %7, %8 : vector<64x128xf32>
    %10 = arith.truncf %9 : vector<64x128xf32> to vector<64x128xbf16>
    %c0_8 = arith.constant 0 : index
    %c0_9 = arith.constant 0 : index
    %11 = vector.load %arg4[%c0_8, %c0_9] : memref<128x8xbf16, #tpu.memory_space<vmem>>, vector<128x8xbf16>
    %cst_10 = arith.constant dense<0.000000e+00> : vector<64x8xf32>
    %12 = tpu.matmul %10, %11, %cst_10 {dimension_numbers = #tpu.dot_dimension_numbers<[1], [0], [0], [1], [0, 0, 1, 1], [], []>} : vector<64x128xbf16>, vector<128x8xbf16>, vector<64x8xf32> -> vector<64x8xf32>
    %c0_11 = arith.constant 0 : index
    %c0_12 = arith.constant 0 : index
    %13 = vector.load %arg6[%c0_11, %c0_12] : memref<64x8xf32, #tpu.memory_space<vmem>>, vector<64x8xf32>
    %14 = arith.addf %12, %13 : vector<64x8xf32>
    %c0_13 = arith.constant 0 : index
    %c0_14 = arith.constant 0 : index
    %15 = vector.load %arg7[%c0_13, %c0_14] : memref<64x8xf32, #tpu.memory_space<vmem>>, vector<64x8xf32>
    tpu.vector_store %arg7[%c0_13, %c0_14], %14 {strides = array<i32>} : memref<64x8xf32, #tpu.memory_space<vmem>>, vector<64x8xf32>,
    return
  }
  func.func @transform_0(%arg0: i32) -> (i32, i32) {
    %c0_i32 = arith.constant 0 : i32
    %c0_i32_0 = arith.constant 0 : i32
    return %arg0, %c0_i32 : i32, i32
  }
  func.func @transform_1(%arg0: i32) -> (i32, i32) {
    %c0_i32 = arith.constant 0 : i32
    %c0_i32_0 = arith.constant 0 : i32
    %c0_i32_1 = arith.constant 0 : i32
    return %c0_i32, %c0_i32_0 : i32, i32
  }
  func.func @transform_2(%arg0: i32) -> (i32, i32) {
    %c0_i32 = arith.constant 0 : i32
    %c0_i32_0 = arith.constant 0 : i32
    %c0_i32_1 = arith.constant 0 : i32
    return %c0_i32, %c0_i32_0 : i32, i32
  }
  func.func @transform_3(%arg0: i32) -> (i32, i32) {
    %c0_i32 = arith.constant 0 : i32
    %c0_i32_0 = arith.constant 0 : i32
    %c0_i32_1 = arith.constant 0 : i32
    return %c0_i32, %c0_i32_0 : i32, i32
  }
  func.func @transform_4(%arg0: i32) -> (i32, i32) {
    %c0_i32 = arith.constant 0 : i32
    %c0_i32_0 = arith.constant 0 : i32
    return %arg0, %c0_i32 : i32, i32
  }
  func.func @transform_5(%arg0: i32) -> (i32, i32) {
    %c0_i32 = arith.constant 0 : i32
    %c0_i32_0 = arith.constant 0 : i32
    return %arg0, %c0_i32 : i32, i32
  }
  func.func @transform_6(%arg0: i32) -> (i32, i32) {
    %c0_i32 = arith.constant 0 : i32
    %c0_i32_0 = arith.constant 0 : i32
    return %arg0, %c0_i32 : i32, i32
  }
}

</mosaic_0001>

<bundles_post_ra>
// kernel: mh_moe_forward.3
= control target key start
LH: loop header
LB: loop body
LE: loop exit
PB: predicated region body
PF: predicated region fallthrough
CT: control target
= control target key end

     0   :  { %vm19_vm0 = vcmask 261120   ;;  %v137_v0 = vmov 0.0   ;;  %vm138_vm1 = vmmov 0   ;;  %s184_s1 = inlined_call_operand.vmem [shape: bf16[32,32], index: 1, kind: input, shape index: {}]   ;;  %s185_s0 = inlined_call_operand.vmem [shape: bf16[16,32], index: 0, kind: input, shape index: {}]   ;;  %s186_s2 = inlined_call_operand.vmem [shape: f32[1,32], index: 2, kind: input, shape index: {}]   ;;  %s187_s3 = inlined_call_operand.vmem [shape: f32[16,32], index: 3, kind: output, shape index: {}]  }
   0x1   :  { %124 = vmatprep.subr.bf16.mxu0 %v137_v0  ;;  %v134_v1 = vld [vmem:[%s184_s1 + $0x8] sm:$0xff]   ;;  %128 = vmatprep.mubr.msk.bf16.mxu0 %vm138_vm1, %v137_v0  ;;  %20 = vst.msk [vmem:[#allocation2] sm:$0xff] %vm19_vm0, %v137_v0  ;;  %21 = vst.msk [vmem:[#allocation2 + $0x8] sm:$0xff] %vm19_vm0, %v137_v0  ;;  %v135_v2 = vld [vmem:[%s184_s1] sm:$0xff]  }
   0x2   :  { %125 = vmatpush3.bf16.msra.mxu0 %v134_v1  ;;  %v136_v3 = vld [vmem:[%s185_s0] sm:$0xff]  }
   0x3   :  { %126 = vmatprep.subr.bf16.mxu0 %v137_v0  ;;  %v120_v12 = vld [vmem:[%s186_s2] ss:$0 sm:$0xff] }
   0x6   :  { %127 = vmatpush3.bf16.msra.mxu0 %v135_v2 }
   0x8   :  { %v22_v4 = vld [vmem:[#allocation2] sm:$0xff]  ;;  %v23_v8 = vld [vmem:[#allocation2 + $0x8] sm:$0xff] }
   0x9   :  { %129 = vmatmul.mubr.msk.bf16.vlgmr.msra.gmra.mxu0 %vm19_vm0, %v136_v3 }
  0xc9   :  { %v85_v5 = vpop.f32.mrf.mxu0 }
  0xca   :  { %v92_v6 = vadd.f32 %v85_v5, %v22_v4 }
  0xcb   :  { %v130_v7 = vpop.f32.mrf.mxu0 }
  0xcc   :  { %94 = vst.msk [vmem:[#allocation2] sm:$0xff] %vm19_vm0, %v92_v6 }
  0xcd   :  { %v88_v9 = vpop.f32.mrf.mxu0 }
  0xce   :  { %v93_v10 = vadd.f32 %v88_v9, %v23_v8 }
  0xcf   :  { %v131_v11 = vpop.f32.mrf.mxu0 }
  0xd0   :  { %95 = vst.msk [vmem:[#allocation2 + $0x8] sm:$0xff] %vm19_vm0, %v93_v10 }
  0xd3   :  { %v99_v13 = vld [vmem:[#allocation2] sm:$0xff] }
  0xd4   :  { %v108_v14 = vadd.f32 %v120_v12, %v99_v13 }
  0xd6   :  { %110 = vst.msk [vmem:[%s187_s3] sm:$0xff] %vm19_vm0, %v108_v14 }
  0xd7   :  { %v100_v15 = vld [vmem:[#allocation2 + $0x8] sm:$0xff] }
  0xd8   :  { %v109_v16 = vadd.f32 %v120_v12, %v100_v15 }
  0xda   :  { %111 = vst.msk [vmem:[%s187_s3 + $0x8] sm:$0xff] %vm19_vm0, %v109_v16 }

// kernel: mh_moe_forward.5
= control target key start
LH: loop header
LB: loop body
LE: loop exit
PB: predicated region body
PF: predicated region fallthrough
CT: control target
= control target key end

     0   :  { %v175_v1 = vmov 0.0   ;;  %vm176_vm0 = vmmov 0   ;;  %vm20_vm1 = vcmask 261120   ;;  %s222_s0 = inlined_call_operand.vmem [shape: bf16[16,32], index: 0, kind: input, shape index: {}]   ;;  %s223_s1 = inlined_call_operand.vmem [shape: bf16[32,32], index: 1, kind: input, shape index: {}]   ;;  %s224_s2 = inlined_call_operand.vmem [shape: f32[1,32], index: 2, kind: input, shape index: {}]   ;;  %s225_s3 = inlined_call_operand.hbm [shape: f32[16,32], index: 3, kind: output, shape index: {}]  }
   0x1   :  { %v150_v0 = vld [vmem:[%s223_s1 + $0x8] sm:$0xff]   ;;  %137 = vmatprep.subr.bf16.mxu0 %v175_v1  ;;  %v151_v2 = vld [vmem:[%s223_s1] sm:$0xff]   ;;  %141 = vmatprep.mubr.msk.bf16.mxu0 %vm176_vm0, %v175_v1  ;;  %21 = vst.msk [vmem:[#allocation2] sm:$0xff] %vm20_vm1, %v175_v1  ;;  %22 = vst.msk [vmem:[#allocation2 + $0x8] sm:$0xff] %vm20_vm1, %v175_v1 }
   0x2   :  { %138 = vmatpush3.bf16.msra.mxu0 %v150_v0 }
   0x3   :  { %139 = vmatprep.subr.bf16.mxu0 %v175_v1 }
   0x4   :  { %8 = vsyncpa [#allocation4], 0  ;;  %v152_v3 = vld [vmem:[%s222_s0] sm:$0xff]   ;;  %s177_s0 = smov [#allocation3]  }
   0x5   :  { %v133_v12 = vld [vmem:[%s224_s2] ss:$0 sm:$0xff]  ;;  %s118_s19 = sshll.u32 %s177_s0, 4  ;;  %s119_s19 = int_to_ptr.vmem [resolvable:$true] %s118_s19 }
   0x6   :  { %140 = vmatpush3.bf16.msra.mxu0 %v151_v2  ;;  %s153_s20 = scalar_lea.vmem %s119_s19, 256  ;;  %p158_p1 = scmp.lt.s32.totalorder %s119_s19, %s119_s19 }
   0x7   :  { %p154_p0 = scmp.ne.s32.totalorder %s119_s19, %s153_s20  ;;  %p159_p2 = scmp.lt.s32.totalorder %s153_s20, %s153_s20 }
   0x8   :  { %v23_v4 = vld [vmem:[#allocation2] sm:$0xff]  ;;  %v24_v8 = vld [vmem:[#allocation2 + $0x8] sm:$0xff] }
   0x9   :  { %142 = vmatmul.mubr.msk.bf16.vlgmr.msra.gmra.mxu0 %vm20_vm1, %v152_v3  ;;  %p160_p3 = por %p159_p2, %p158_p1 }
   0xb   :  { %p161_p4 = pnand %p160_p3, %p154_p0 }
  0xc9   :  { %v86_v5 = vpop.f32.mrf.mxu0 }
  0xca   :  { %v93_v6 = vadd.f32 %v86_v5, %v23_v4 }
  0xcb   :  { %v143_v7 = vpop.f32.mrf.mxu0 }
  0xcc   :  { %95 = vst.msk [vmem:[#allocation2] sm:$0xff] %vm20_vm1, %v93_v6 }
  0xcd   :  { %v89_v9 = vpop.f32.mrf.mxu0 }
  0xce   :  { %v94_v10 = vadd.f32 %v89_v9, %v24_v8 }
  0xcf   :  { %v144_v11 = vpop.f32.mrf.mxu0 }
  0xd0   :  { %96 = vst.msk [vmem:[#allocation2 + $0x8] sm:$0xff] %vm20_vm1, %v94_v10 }
  0xd3   :  { %v100_v13 = vld [vmem:[#allocation2] sm:$0xff] }
  0xd4   :  { %v109_v14 = vadd.f32 %v133_v12, %v100_v13 }
  0xd6   :  { %111 = vst.msk [vmem:[#allocation3] sm:$0xff] %vm20_vm1, %v109_v14 }
  0xd7   :  { %v101_v15 = vld [vmem:[#allocation2 + $0x8] sm:$0xff] }
  0xd8   :  { %v110_v16 = vadd.f32 %v133_v12, %v101_v15 }
  0xda   :  { %112 = vst.msk [vmem:[#allocation3 + $0x8] sm:$0xff] %vm20_vm1, %v110_v16 }
  0xdb   :  { %164 = shalt.err (!%p161_p4)
}
  0xdc   :  { %s178_s21 = smov 128   ;;  %s179_s2 = smov 8  }
  0xdd   :  { %124 = dma.vmem_to_hbm [thread:$0]  %s119_s19, 256, %s225_s3, [#allocation4], %s178_s21, %s178_s21, %s179_s2  }
  0xde   :  { %173 = dma.done.wait [#allocation4], 256  }
  0xdf   :  { %174 = vsyncadd [#allocation4], 4294967040 }
  0xe0   :  { %128 = vsyncpa [#allocation4], 1 }

// kernel: mh_moe_forward.4
= control target key start
LH: loop header
LB: loop body
LE: loop exit
PB: predicated region body
PF: predicated region fallthrough
CT: control target
= control target key end

     0   :  { %vm73_vm0 = vcmask 1043456   ;;  %vm60_vm1 = vcmask 64512   ;;  %s577_s1 = inlined_call_operand.vmem [shape: bf16[8,128], index: 1, kind: input, shape index: {}]   ;;  %s578_s0 = inlined_call_operand.vmem [shape: bf16[64,8], index: 0, kind: input, shape index: {}]   ;;  %s579_s3 = inlined_call_operand.vmem [shape: bf16[128,8], index: 3, kind: input, shape index: {}]   ;;  %s580_s2 = inlined_call_operand.vmem [shape: f32[1,128], index: 2, kind: input, shape index: {}]   ;;  %s581_s4 = inlined_call_operand.vmem [shape: f32[64,128], index: 4, kind: input, shape index: {}]   ;;  %s582_s5 = inlined_call_operand.vmem [shape: f32[64,8], index: 5, kind: input, shape index: {}]   ;;  %s583_s6 = inlined_call_operand.vmem [shape: f32[64,8], index: 6, kind: output, shape index: {}]  }
   0x1   :  { %v32_v0 = vld [vmem:[%s577_s1] sm:$0xf]  ;;  %v405_v3 = vld [vmem:[%s578_s0 + $0x8] sm:$0xff]   ;;  %v406_v4 = vld [vmem:[%s578_s0 + $0x10] sm:$0xff]  }
   0x2   :  { %403 = vmatprep.subr.msk.bf16.mxu0 %vm73_vm0, %v32_v0  ;;  %v75_v1 = vsel %vm73_vm0, %v32_v0, 0  ;;  %v404_v2 = vld [vmem:[%s578_s0] sm:$0xff]   ;;  %v408_v5 = vld [vmem:[%s579_s3 + $0x38] sm:$0xff]   ;;  %v409_v6 = vld [vmem:[%s579_s3 + $0x30] sm:$0xff]  }
   0x3   :  { %354 = vmatpush3.bf16.msra.mxu0 %v75_v1  ;;  %355 = vmatprep.mubr.msk.bf16.mxu0 %vm60_vm1, %v404_v2  ;;  %v407_v7 = vld [vmem:[%s578_s0 + $0x18] sm:$0xff]   ;;  %v410_v8 = vld [vmem:[%s579_s3 + $0x28] sm:$0xff]   ;;  %v411_v9 = vld [vmem:[%s579_s3 + $0x20] sm:$0xff]  }
   0x4   :  { %363 = vmatprep.subr.bf16.mxu0 %v408_v5  ;;  %387 = vmatprep.subr.bf16.mxu1 %v408_v5  ;;  %v412_v10 = vld [vmem:[%s579_s3 + $0x18] sm:$0xff]   ;;  %v413_v11 = vld [vmem:[%s579_s3 + $0x10] sm:$0xff]   ;;  %v414_v12 = vld [vmem:[%s579_s3 + $0x8] sm:$0xff]  }
   0x5   :  { %395 = vmatpush3.bf16.msra.mxu1 %v408_v5  ;;  %v415_v13 = vld [vmem:[%s579_s3] sm:$0xff]   ;;  %v153_v24 = vld [vmem:[%s581_s4 + $0x18] sm:$0xff]  ;;  %v151_v28 = vld [vmem:[%s581_s4 + $0x8] sm:$0xff] }
   0x6   :  { %356 = vmatmul.mubr.msk.bf16.vlgmr.msra.gmra.mxu0 %vm60_vm1, %v405_v3  ;;  %388 = vmatprep.subr.bf16.mxu1 %v409_v6  ;;  %v319_v15 = vld [vmem:[%s580_s2] ss:$0 sm:$0xff]  ;;  %v152_v30 = vld [vmem:[%s581_s4 + $0x10] sm:$0xff]  ;;  %v157_v46 = vld [vmem:[%s581_s4 + $0x38] sm:$0xff] }
   0x7   :  { %359 = vmatprep.mubr.msk.bf16.mxu0 %vm60_vm1, %v406_v4  ;;  %364 = vmatpush3.bf16.msra.mxu0 %v408_v5  ;;  %v150_v27 = vld [vmem:[%s581_s4] sm:$0xff]  ;;  %v155_v50 = vld [vmem:[%s581_s4 + $0x28] sm:$0xff]  ;;  %v156_v51 = vld [vmem:[%s581_s4 + $0x30] sm:$0xff] }
   0x8   :  { %365 = vmatprep.subr.bf16.mxu0 %v409_v6  ;;  %v154_v49 = vld [vmem:[%s581_s4 + $0x20] sm:$0xff]  ;;  %v188_v59 = vld [vmem:[%s582_s5 + $0x10] sm:$0xff]  ;;  %v189_v0 = vld [vmem:[%s582_s5 + $0x18] sm:$0xff] }
   0x9   :  { %396 = vmatpush3.bf16.msra.mxu1 %v409_v6  ;;  %v186_v61 = vld [vmem:[%s582_s5] sm:$0xff]  ;;  %v187_v3 = vld [vmem:[%s582_s5 + $0x8] sm:$0xff] }
   0xa   :  { %389 = vmatprep.subr.bf16.mxu1 %v410_v8 }
   0xb   :  { %366 = vmatpush3.bf16.msra.mxu0 %v409_v6  ;;  %v192_v6 = vld [vmem:[%s582_s5 + $0x30] sm:$0xff] }
   0xc   :  { %367 = vmatprep.subr.bf16.mxu0 %v410_v8 }
   0xd   :  { %397 = vmatpush3.bf16.msra.mxu1 %v410_v8 }
   0xe   :  { %360 = vmatmul.mubr.msk.bf16.gmra.mxu0 %vm60_vm1, %v407_v7  ;;  %390 = vmatprep.subr.bf16.mxu1 %v411_v9 }
   0xf   :  { %368 = vmatpush3.bf16.msra.mxu0 %v410_v8 }
  0x10   :  { %369 = vmatprep.subr.bf16.mxu0 %v411_v9 }
  0x11   :  { %398 = vmatpush3.bf16.msra.mxu1 %v411_v9 }
  0x12   :  { %391 = vmatprep.subr.bf16.mxu1 %v412_v10 }
  0x13   :  { %370 = vmatpush3.bf16.msra.mxu0 %v411_v9  ;;  %v190_v9 = vld [vmem:[%s582_s5 + $0x20] sm:$0xff] }
  0x14   :  { %371 = vmatprep.subr.bf16.mxu0 %v412_v10 }
  0x15   :  { %399 = vmatpush3.bf16.msra.mxu1 %v412_v10 }
  0x16   :  { %392 = vmatprep.subr.bf16.mxu1 %v413_v11 }
  0x17   :  { %372 = vmatpush3.bf16.msra.mxu0 %v412_v10 }
  0x18   :  { %373 = vmatprep.subr.bf16.mxu0 %v413_v11 }
  0x19   :  { %400 = vmatpush3.bf16.msra.mxu1 %v413_v11 }
  0x1a   :  { %393 = vmatprep.subr.bf16.mxu1 %v414_v12 }
  0x1b   :  { %374 = vmatpush3.bf16.msra.mxu0 %v413_v11 }
  0x1c   :  { %375 = vmatprep.subr.bf16.mxu0 %v414_v12 }
  0x1d   :  { %401 = vmatpush3.bf16.msra.mxu1 %v414_v12 }
  0x1e   :  { %394 = vmatprep.subr.bf16.mxu1 %v415_v13 }
  0x1f   :  { %376 = vmatpush3.bf16.msra.mxu0 %v414_v12  ;;  %v193_v12 = vld [vmem:[%s582_s5 + $0x38] sm:$0xff] }
  0x20   :  { %377 = vmatprep.subr.bf16.mxu0 %v415_v13 }
  0x21   :  { %402 = vmatpush3.bf16.msra.mxu1 %v415_v13 }
  0x23   :  { %378 = vmatpush3.bf16.msra.mxu0 %v415_v13 }
  0xc6   :  { %v357_v14 = vpop.f32.mrf.mxu0 }
  0xc7   :  { %v120_v18 = vadd.f32 %v357_v14, %v319_v15 }
  0xc8   :  { %v111_v16 = vpop.f32.mrf.mxu0 }
  0xc9   :  { %v112_v17 = vadd.f32 %v319_v15, %v111_v16  ;;  %v144_v26 = vmax.f32 %v120_v18, 0.0 }
  0xca   :  { %v358_v19 = vpop.f32.mrf.mxu0 }
  0xcb   :  { %v123_v20 = vadd.f32 %v358_v19, %v319_v15  ;;  %v142_v22 = vmax.f32 %v112_v17, 0.0  ;;  %v160_v37 = vmul.f32 %v152_v30, %v144_v26 }
  0xcc   :  { %v114_v21 = vpop.f32.mrf.mxu0 }
  0xcd   :  { %v145_v23 = vmax.f32 %v123_v20, 0.0  ;;  %v115_v25 = vadd.f32 %v319_v15, %v114_v21  ;;  %v158_v34 = vmul.f32 %v150_v27, %v142_v22 }
  0xce   :  { %v361_v29 = vpop.f32.mrf.mxu0 }
  0xcf   :  { %v143_v31 = vmax.f32 %v115_v25, 0.0  ;;  %v161_v32 = vmul.f32 %v153_v24, %v145_v23  ;;  %v136_v38 = vadd.f32 %v361_v29, %v319_v15 }
  0xd0   :  { %v127_v33 = vpop.f32.mrf.mxu0 }
  0xd1   :  { %v159_v35 = vmul.f32 %v151_v28, %v143_v31  ;;  %v128_v36 = vadd.f32 %v319_v15, %v127_v33  ;;  %v167_v42 = vpack.c.bf16 %v161_v32, %v160_v37  ;;  %v148_v48 = vmax.f32 %v136_v38, 0.0 }
  0xd2   :  { %v362_v39 = vpop.f32.mrf.mxu0 }
  0xd3   :  { %v139_v40 = vadd.f32 %v362_v39, %v319_v15  ;;  %v166_v41 = vpack.c.bf16 %v159_v35, %v158_v34  ;;  %v146_v44 = vmax.f32 %v128_v36, 0.0  ;;  %v164_v56 = vmul.f32 %v156_v51, %v148_v48 }
  0xd4   :  { %v130_v43 = vpop.f32.mrf.mxu0 }
  0xd5   :  { %v149_v45 = vmax.f32 %v139_v40, 0.0  ;;  %v131_v47 = vadd.f32 %v319_v15, %v130_v43  ;;  %379 = vmatprep.mubr.bf16.mxu0 %v166_v41  ;;  %v162_v54 = vmul.f32 %v154_v49, %v146_v44  ;;  %v191_v15 = vld [vmem:[%s582_s5 + $0x28] sm:$0xff] }
  0xd6   :  { %380 = vmatmul.mubr.bf16.vlgmr.msra.gmra.mxu0 %v167_v42 }
  0xd7   :  { %v147_v52 = vmax.f32 %v131_v47, 0.0  ;;  %v165_v53 = vmul.f32 %v157_v46, %v149_v45 }
  0xd9   :  { %v163_v55 = vmul.f32 %v155_v50, %v147_v52  ;;  %v169_v58 = vpack.c.bf16 %v165_v53, %v164_v56 }
  0xdb   :  { %v168_v57 = vpack.c.bf16 %v163_v55, %v162_v54 }
  0xdd   :  { %383 = vmatprep.mubr.bf16.mxu1 %v168_v57 }
  0xde   :  { %384 = vmatmul.mubr.bf16.vlgmr.msra.gmra.mxu1 %v169_v58 }
 0x196   :  { %v381_v60 = vpop.f32.mrf.mxu0 }
 0x197   :  { %v285_v62 = vadd.f32 %v381_v60, %v188_v59 }
 0x198   :  { %v276_v63 = vpop.f32.mrf.mxu0 }
 0x199   :  { %309 = vst.msk [vmem:[%s583_s6 + $0x10] sm:$0xff] %vm60_vm1, %v285_v62  ;;  %v277_v1 = vadd.f32 %v276_v63, %v186_v61 }
 0x19a   :  { %v382_v2 = vpop.f32.mrf.mxu0 }
 0x19b   :  { %307 = vst.msk [vmem:[%s583_s6] sm:$0xff] %vm60_vm1, %v277_v1  ;;  %v288_v4 = vadd.f32 %v382_v2, %v189_v0 }
 0x19c   :  { %v279_v5 = vpop.f32.mrf.mxu0 }
 0x19d   :  { %310 = vst.msk [vmem:[%s583_s6 + $0x18] sm:$0xff] %vm60_vm1, %v288_v4  ;;  %v280_v7 = vadd.f32 %v279_v5, %v187_v3 }
 0x19e   :  { %v385_v8 = vpop.f32.mrf.mxu1 }
 0x19f   :  { %308 = vst.msk [vmem:[%s583_s6 + $0x8] sm:$0xff] %vm60_vm1, %v280_v7  ;;  %v301_v10 = vadd.f32 %v385_v8, %v192_v6 }
 0x1a0   :  { %v292_v11 = vpop.f32.mrf.mxu1 }
 0x1a1   :  { %313 = vst.msk [vmem:[%s583_s6 + $0x30] sm:$0xff] %vm60_vm1, %v301_v10  ;;  %v293_v13 = vadd.f32 %v292_v11, %v190_v9 }
 0x1a2   :  { %v386_v14 = vpop.f32.mrf.mxu1 }
 0x1a3   :  { %311 = vst.msk [vmem:[%s583_s6 + $0x20] sm:$0xff] %vm60_vm1, %v293_v13  ;;  %v304_v16 = vadd.f32 %v386_v14, %v193_v12 }
 0x1a4   :  { %v295_v17 = vpop.f32.mrf.mxu1 }
 0x1a5   :  { %314 = vst.msk [vmem:[%s583_s6 + $0x38] sm:$0xff] %vm60_vm1, %v304_v16  ;;  %v296_v18 = vadd.f32 %v295_v17, %v191_v15 }
 0x1a7   :  { %312 = vst.msk [vmem:[%s583_s6 + $0x28] sm:$0xff] %vm60_vm1, %v296_v18 }

</bundles_post_ra>
